<compile_context>
chip_gen: v7x
topology: tpu7x:2x2x1
jax: 0.10.0
libtpu: 0.0.40
codegen_flags: <defaults>
</compile_context>

<pallas_src>
import functools

import jax
import jax.numpy as jnp
from jax.experimental import pallas as pl
from jax.experimental.pallas import tpu as pltpu

IN_DIM = 3
HID_DIM = 3
OUT_DIM = 1

SUB = 8      # sublane padding for the tiny feature axis
LANE = 128   # lane granularity for the batch axis


def _round_up(a, b):
    return (a + b - 1) // b * b


def pack_params(w1, b1, w2, b2):
    """Pack PyTorch-layout Linear params into one (16,) f32 vector.

    Do this ONCE at parameter-init time (hoisted out of the per-call forward):
      p[3*j + i] = w1[j, i]   (fc1 weight, (out=3, in=3))
      p[9 + j]   = b1[j]      (fc1 bias)
      p[12 + j]  = w2[0, j]   (fc2 weight, (out=1, in=3))
      p[15]      = b2[0]      (fc2 bias)
    """
    return jnp.concatenate([
        jnp.asarray(w1, jnp.float32).reshape(-1),
        jnp.asarray(b1, jnp.float32).reshape(-1),
        jnp.asarray(w2, jnp.float32).reshape(-1),
        jnp.asarray(b2, jnp.float32).reshape(-1),
    ])


def _stable_sigmoid(z):
    # Numerically stable sigmoid using only exp/div/where (no inf intermediate).
    ez = jnp.exp(-jnp.abs(z))           # in (0, 1], never overflows
    s = ez / (1.0 + ez)                 # = sigmoid(-|z|)
    return jnp.where(z >= 0.0, 1.0 - s, s)


def _mlp_kernel(p_ref, x_ref, o_ref):
    # p_ref: SMEM (16,) f32 packed params (scalar-prefetched)
    # x_ref: VMEM (8, TN)  -- sublanes 0..2 hold the input features, 3..7 are zero
    # o_ref: VMEM (1, TN)  -- lane-dense output row
    x0 = x_ref[0:1, :]
    x1 = x_ref[1:2, :]
    x2 = x_ref[2:3, :]
    # fc1 + sigmoid (scalar-broadcast FMAs on the VPU, exp on the EUP)
    h0 = _stable_sigmoid(p_ref[0] * x0 + p_ref[1] * x1 + p_ref[2] * x2 + p_ref[9])
    h1 = _stable_sigmoid(p_ref[3] * x0 + p_ref[4] * x1 + p_ref[5] * x2 + p_ref[10])
    h2 = _stable_sigmoid(p_ref[6] * x0 + p_ref[7] * x1 + p_ref[8] * x2 + p_ref[11])
    # fc2
    o_ref[...] = p_ref[12] * h0 + p_ref[13] * h1 + p_ref[14] * h2 + p_ref[15]


@functools.partial(jax.jit, static_argnames=("tile_n",))
def mlp_forward(params, x, *, tile_n=2048):
    """params: (16,) f32 from pack_params. x: (N, 3) f32. Returns (N, 1) f32."""
    n = x.shape[0]
    tn = min(tile_n, _round_up(n, LANE))   # lane tile, multiple of 128
    n_pad = _round_up(n, tn)
    num_tiles = n_pad // tn

    # Batch on the lane axis: (N, 3) -> (8, N_pad), zero-padded.
    x_t = jnp.zeros((SUB, n_pad), jnp.float32).at[:IN_DIM, :n].set(x.T)

    out = pl.pallas_call(
        _mlp_kernel,
        out_shape=jax.ShapeDtypeStruct((1, n_pad), jnp.float32),
        grid_spec=pltpu.PrefetchScalarGridSpec(
            num_scalar_prefetch=1,           # params land in SMEM
            grid=(num_tiles,),
            in_specs=[pl.BlockSpec((SUB, tn), lambda i, p: (0, i))],
            out_specs=pl.BlockSpec((1, tn), lambda i, p: (0, i)),
        ),
        compiler_params=pltpu.CompilerParams(
            # Batch tiles are independent -> megacore-shardable on v7x,
            # harmless on v5e/v6e.
            dimension_semantics=("parallel",),
        ),
    )(params, x_t)

    return out[0, :n].reshape(n, OUT_DIM)


if __name__ == "__main__":
    key = jax.random.PRNGKey(0)
    kx, k1, k2, k3, k4 = jax.random.split(key, 5)

    N = 8  # small batch
    x = jax.random.normal(kx, (N, IN_DIM), jnp.float32)

    # PyTorch Linear layouts: weight (out, in), bias (out,)
    w1 = jax.random.normal(k1, (HID_DIM, IN_DIM), jnp.float32) * 0.5
    b1 = jax.random.normal(k2, (HID_DIM,), jnp.float32) * 0.1
    w2 = jax.random.normal(k3, (OUT_DIM, HID_DIM), jnp.float32) * 0.5
    b2 = jax.random.normal(k4, (OUT_DIM,), jnp.float32) * 0.1

    params = pack_params(w1, b1, w2, b2)   # packed once, reused for every forward

    out = jax.block_until_ready(mlp_forward(params, x))

    # Pure-JAX reference.
    ref = jax.nn.sigmoid(x @ w1.T + b1) @ w2.T + b2
    assert out.shape == (N, OUT_DIM)
    assert jnp.allclose(out, ref, atol=1e-5, rtol=1e-5)

    # Exercise the multi-tile (pipelined grid) path at a modest batch size.
    N2 = 2050
    x2 = jax.random.normal(kx, (N2, IN_DIM), jnp.float32)
    out2 = jax.block_until_ready(mlp_forward(params, x2, tile_n=512))
    ref2 = jax.nn.sigmoid(x2 @ w1.T + b1) @ w2.T + b2
    assert jnp.allclose(out2, ref2, atol=1e-5, rtol=1e-5)

    print("KERNEL_OK")
</pallas_src>

<mosaic_0001>
module attributes {stable_mosaic.version = 11 : i64} {
  func.func @_mlp_kernel(%arg0: i32, %arg1: memref<16xf32, #tpu.memory_space<smem>>, %arg2: memref<8x128xf32, #tpu.memory_space<vmem>>, %arg3: memref<1x128xf32, #tpu.memory_space<vmem>>) attributes {dimension_semantics = [#tpu.dimension_semantics<parallel>], iteration_bounds = array<i64: 1>, scalar_prefetch = 1 : i64, scratch_operands = 0 : i64, tpu.core_type = #tpu.core_type<tc>, window_params = [{transform_indices = @transform_0, window_bounds = array<i64: 8, 128>}, {transform_indices = @transform_1, window_bounds = array<i64: 1, 128>}]} {
    %c0 = arith.constant 0 : index
    %c0_0 = arith.constant 0 : index
    %0 = vector.load %arg2[%c0, %c0_0] : memref<8x128xf32, #tpu.memory_space<vmem>>, vector<1x128xf32>
    %c1 = arith.constant 1 : index
    %c0_1 = arith.constant 0 : index
    %1 = vector.load %arg2[%c1, %c0_1] : memref<8x128xf32, #tpu.memory_space<vmem>>, vector<1x128xf32>
    %c2 = arith.constant 2 : index
    %c0_2 = arith.constant 0 : index
    %2 = vector.load %arg2[%c2, %c0_2] : memref<8x128xf32, #tpu.memory_space<vmem>>, vector<1x128xf32>
    %c0_3 = arith.constant 0 : index
    %3 = memref.load %arg1[%c0_3] : memref<16xf32, #tpu.memory_space<smem>>
    %4 = vector.broadcast %3 : f32 to vector<1x128xf32>
    %5 = arith.mulf %4, %0 : vector<1x128xf32>
    %c1_4 = arith.constant 1 : index
    %6 = memref.load %arg1[%c1_4] : memref<16xf32, #tpu.memory_space<smem>>
    %7 = vector.broadcast %6 : f32 to vector<1x128xf32>
    %8 = arith.mulf %7, %1 : vector<1x128xf32>
    %9 = arith.addf %5, %8 : vector<1x128xf32>
    %c2_5 = arith.constant 2 : index
    %10 = memref.load %arg1[%c2_5] : memref<16xf32, #tpu.memory_space<smem>>
    %11 = vector.broadcast %10 : f32 to vector<1x128xf32>
    %12 = arith.mulf %11, %2 : vector<1x128xf32>
    %13 = arith.addf %9, %12 : vector<1x128xf32>
    %c9 = arith.constant 9 : index
    %14 = memref.load %arg1[%c9] : memref<16xf32, #tpu.memory_space<smem>>
    %15 = vector.broadcast %14 : f32 to vector<1x128xf32>
    %16 = arith.addf %13, %15 : vector<1x128xf32>
    %17 = math.absf %16 : vector<1x128xf32>
    %cst = arith.constant 0.000000e+00 : f32
    %18 = vector.broadcast %cst : f32 to vector<1x128xf32>
    %19 = arith.subf %18, %17 : vector<1x128xf32>
    %20 = math.exp %19 : vector<1x128xf32>
    %cst_6 = arith.constant 1.000000e+00 : f32
    %21 = vector.broadcast %cst_6 : f32 to vector<1x128xf32>
    %22 = arith.addf %21, %20 : vector<1x128xf32>
    %23 = arith.divf %20, %22 : vector<1x128xf32>
    %cst_7 = arith.constant 0.000000e+00 : f32
    %24 = vector.broadcast %cst_7 : f32 to vector<1x128xf32>
    %25 = arith.cmpf oge, %16, %24 : vector<1x128xf32>
    %cst_8 = arith.constant 1.000000e+00 : f32
    %26 = vector.broadcast %cst_8 : f32 to vector<1x128xf32>
    %27 = arith.subf %26, %23 : vector<1x128xf32>
    %28 = arith.select %25, %27, %23 : vector<1x128xi1>, vector<1x128xf32>
    %c3 = arith.constant 3 : index
    %29 = memref.load %arg1[%c3] : memref<16xf32, #tpu.memory_space<smem>>
    %30 = vector.broadcast %29 : f32 to vector<1x128xf32>
    %31 = arith.mulf %30, %0 : vector<1x128xf32>
    %c4 = arith.constant 4 : index
    %32 = memref.load %arg1[%c4] : memref<16xf32, #tpu.memory_space<smem>>
    %33 = vector.broadcast %32 : f32 to vector<1x128xf32>
    %34 = arith.mulf %33, %1 : vector<1x128xf32>
    %35 = arith.addf %31, %34 : vector<1x128xf32>
    %c5 = arith.constant 5 : index
    %36 = memref.load %arg1[%c5] : memref<16xf32, #tpu.memory_space<smem>>
    %37 = vector.broadcast %36 : f32 to vector<1x128xf32>
    %38 = arith.mulf %37, %2 : vector<1x128xf32>
    %39 = arith.addf %35, %38 : vector<1x128xf32>
    %c10 = arith.constant 10 : index
    %40 = memref.load %arg1[%c10] : memref<16xf32, #tpu.memory_space<smem>>
    %41 = vector.broadcast %40 : f32 to vector<1x128xf32>
    %42 = arith.addf %39, %41 : vector<1x128xf32>
    %43 = math.absf %42 : vector<1x128xf32>
    %cst_9 = arith.constant 0.000000e+00 : f32
    %44 = vector.broadcast %cst_9 : f32 to vector<1x128xf32>
    %45 = arith.subf %44, %43 : vector<1x128xf32>
    %46 = math.exp %45 : vector<1x128xf32>
    %cst_10 = arith.constant 1.000000e+00 : f32
    %47 = vector.broadcast %cst_10 : f32 to vector<1x128xf32>
    %48 = arith.addf %47, %46 : vector<1x128xf32>
    %49 = arith.divf %46, %48 : vector<1x128xf32>
    %cst_11 = arith.constant 0.000000e+00 : f32
    %50 = vector.broadcast %cst_11 : f32 to vector<1x128xf32>
    %51 = arith.cmpf oge, %42, %50 : vector<1x128xf32>
    %cst_12 = arith.constant 1.000000e+00 : f32
    %52 = vector.broadcast %cst_12 : f32 to vector<1x128xf32>
    %53 = arith.subf %52, %49 : vector<1x128xf32>
    %54 = arith.select %51, %53, %49 : vector<1x128xi1>, vector<1x128xf32>
    %c6 = arith.constant 6 : index
    %55 = memref.load %arg1[%c6] : memref<16xf32, #tpu.memory_space<smem>>
    %56 = vector.broadcast %55 : f32 to vector<1x128xf32>
    %57 = arith.mulf %56, %0 : vector<1x128xf32>
    %c7 = arith.constant 7 : index
    %58 = memref.load %arg1[%c7] : memref<16xf32, #tpu.memory_space<smem>>
    %59 = vector.broadcast %58 : f32 to vector<1x128xf32>
    %60 = arith.mulf %59, %1 : vector<1x128xf32>
    %61 = arith.addf %57, %60 : vector<1x128xf32>
    %c8 = arith.constant 8 : index
    %62 = memref.load %arg1[%c8] : memref<16xf32, #tpu.memory_space<smem>>
    %63 = vector.broadcast %62 : f32 to vector<1x128xf32>
    %64 = arith.mulf %63, %2 : vector<1x128xf32>
    %65 = arith.addf %61, %64 : vector<1x128xf32>
    %c11 = arith.constant 11 : index
    %66 = memref.load %arg1[%c11] : memref<16xf32, #tpu.memory_space<smem>>
    %67 = vector.broadcast %66 : f32 to vector<1x128xf32>
    %68 = arith.addf %65, %67 : vector<1x128xf32>
    %69 = math.absf %68 : vector<1x128xf32>
    %cst_13 = arith.constant 0.000000e+00 : f32
    %70 = vector.broadcast %cst_13 : f32 to vector<1x128xf32>
    %71 = arith.subf %70, %69 : vector<1x128xf32>
    %72 = math.exp %71 : vector<1x128xf32>
    %cst_14 = arith.constant 1.000000e+00 : f32
    %73 = vector.broadcast %cst_14 : f32 to vector<1x128xf32>
    %74 = arith.addf %73, %72 : vector<1x128xf32>
    %75 = arith.divf %72, %74 : vector<1x128xf32>
    %cst_15 = arith.constant 0.000000e+00 : f32
    %76 = vector.broadcast %cst_15 : f32 to vector<1x128xf32>
    %77 = arith.cmpf oge, %68, %76 : vector<1x128xf32>
    %cst_16 = arith.constant 1.000000e+00 : f32
    %78 = vector.broadcast %cst_16 : f32 to vector<1x128xf32>
    %79 = arith.subf %78, %75 : vector<1x128xf32>
    %80 = arith.select %77, %79, %75 : vector<1x128xi1>, vector<1x128xf32>
    %c12 = arith.constant 12 : index
    %81 = memref.load %arg1[%c12] : memref<16xf32, #tpu.memory_space<smem>>
    %82 = vector.broadcast %81 : f32 to vector<1x128xf32>
    %83 = arith.mulf %82, %28 : vector<1x128xf32>
    %c13 = arith.constant 13 : index
    %84 = memref.load %arg1[%c13] : memref<16xf32, #tpu.memory_space<smem>>
    %85 = vector.broadcast %84 : f32 to vector<1x128xf32>
    %86 = arith.mulf %85, %54 : vector<1x128xf32>
    %87 = arith.addf %83, %86 : vector<1x128xf32>
    %c14 = arith.constant 14 : index
    %88 = memref.load %arg1[%c14] : memref<16xf32, #tpu.memory_space<smem>>
    %89 = vector.broadcast %88 : f32 to vector<1x128xf32>
    %90 = arith.mulf %89, %80 : vector<1x128xf32>
    %91 = arith.addf %87, %90 : vector<1x128xf32>
    %c15 = arith.constant 15 : index
    %92 = memref.load %arg1[%c15] : memref<16xf32, #tpu.memory_space<smem>>
    %93 = vector.broadcast %92 : f32 to vector<1x128xf32>
    %94 = arith.addf %91, %93 : vector<1x128xf32>
    %c0_17 = arith.constant 0 : index
    %c0_18 = arith.constant 0 : index
    %95 = vector.load %arg3[%c0_17, %c0_18] : memref<1x128xf32, #tpu.memory_space<vmem>>, vector<1x128xf32>
    tpu.vector_store %arg3[%c0_17, %c0_18], %94 {strides = array<i32>} : memref<1x128xf32, #tpu.memory_space<vmem>>, vector<1x128xf32>,
    return
  }
  func.func @transform_0(%arg0: i32, %arg1: memref<16xf32, #tpu.memory_space<smem>>) -> (i32, i32) {
    %c0_i32 = arith.constant 0 : i32
    %c0_i32_0 = arith.constant 0 : i32
    return %c0_i32, %arg0 : i32, i32
  }
  func.func @transform_1(%arg0: i32, %arg1: memref<16xf32, #tpu.memory_space<smem>>) -> (i32, i32) {
    %c0_i32 = arith.constant 0 : i32
    %c0_i32_0 = arith.constant 0 : i32
    return %c0_i32, %arg0 : i32, i32
  }
}

</mosaic_0001>

<bundles_post_ra>
// kernel: mlp_forward.1
= control target key start
LH: loop header
LB: loop body
LE: loop exit
PB: predicated region body
PF: predicated region fallthrough
CT: control target
= control target key end

     0   :  { %s191_s0 = inlined_call_operand.vmem [shape: f32[16], index: 0, kind: input, shape index: {}]   ;;  %s192_s1 = inlined_call_operand.vmem [shape: f32[8,128], index: 1, kind: input, shape index: {}]   ;;  %s193_s2 = inlined_call_operand.vmem [shape: f32[1,128], index: 2, kind: output, shape index: {}]  }
   0x1   :  { %s7_s11 = sshll.u32 %s191_s0, 4  ;;  %s8_s11 = int_to_ptr.vmem [resolvable:$true] %s7_s11 }
   0x2   :  { %s137_s12 = scalar_lea.vmem %s8_s11, 16  ;;  %p142_p1 = scmp.lt.s32.totalorder %s8_s11, %s8_s11 }
   0x3   :  { %p138_p0 = scmp.ne.s32.totalorder %s8_s11, %s137_s12  ;;  %p143_p2 = scmp.lt.s32.totalorder %s137_s12, %s137_s12 }
   0x5   :  { %p144_p3 = por %p143_p2, %p142_p1 }
   0x7   :  { %p145_p4 = pnand %p144_p3, %p138_p0 }
   0x9   :  { %148 = shalt.err (!%p145_p4)  }
   0xa   :  { %s151_s13 = smov [#allocation3]  }
   0xb   :  { %10 = dma.vmem_to_smem %s8_s11, 16, %s151_s13, [#allocation2] }
   0xc   :  { %149 = dma.done.wait [#allocation2], 16 }
   0xd   :  { %150 = vsyncadd [#allocation2], 4294967280 }
   0xe   :  { %12 = sfence }
   0xf   :  { %s18_s14 = sld [smem:[#allocation3]]  ;;  %s109_s15 = sld [smem:[#allocation3 + $0x1]]  ;;  %v15_v0 = vld [vmem:[%s192_s1] sm:$0x1]  ;;  %v16_v1 = vld [vmem:[%s192_s1 + $0x1] sm:$0x1] }
  0x10   :  { %s110_s16 = sld [smem:[#allocation3 + $0x2]]  ;;  %s170_s17 = sld [smem:[#allocation3 + $0x9]]  ;;  %v17_v2 = vld [vmem:[%s192_s1 + $0x2] sm:$0x1] }
  0x11   :  { %s112_s18 = sld [smem:[#allocation3 + $0x3]]  ;;  %s113_s0 = sld [smem:[#allocation3 + $0x4]] }
  0x12   :  { %s114_s21 = sld [smem:[#allocation3 + $0x5]]  ;;  %s175_s22 = sld [smem:[#allocation3 + $0xa]] }
  0x13   :  { %s116_s25 = sld [smem:[#allocation3 + $0x6]]  ;;  %s117_s26 = sld [smem:[#allocation3 + $0x7]] }
  0x14   :  { %s118_s29 = sld [smem:[#allocation3 + $0x8]]  ;;  %s183_s30 = sld [smem:[#allocation3 + $0xb]] }
  0x15   :  { %v19_v3 = vstv %s18_s14  ;;  %v22_v4 = vstv %s109_s15  ;;  %s120_s1 = sld [smem:[#allocation3 + $0xc]]  ;;  %s121_s3 = sld [smem:[#allocation3 + $0xd]] }
  0x16   :  { %v20_v5 = vmul.f32 %v19_v3, %v15_v0  ;;  %v23_v6 = vmul.f32 %v22_v4, %v16_v1  ;;  %v26_v7 = vstv %s110_s16  ;;  %v30_v15 = vstv %s170_s17  ;;  %s122_s4 = sld [smem:[#allocation3 + $0xe]]  ;;  %s123_s5 = sld [smem:[#allocation3 + $0xf]] }
  0x17   :  { %v27_v8 = vmul.f32 %v26_v7, %v17_v2  ;;  %v43_v9 = vstv %s112_s18  ;;  %v46_v10 = vstv %s113_s0 }
  0x18   :  { %v24_v11 = vadd.f32 %v23_v6, %v20_v5  ;;  %v44_v12 = vmul.f32 %v43_v9, %v15_v0  ;;  %v47_v13 = vmul.f32 %v46_v10, %v16_v1  ;;  %v50_v14 = vstv %s114_s21 }
  0x19   :  { %v51_v16 = vmul.f32 %v50_v14, %v17_v2  ;;  %v67_v17 = vstv %s116_s25  ;;  %v70_v18 = vstv %s117_s26  ;;  %v54_v23 = vstv %s175_s22 }
  0x1a   :  { %v28_v19 = vadd.f32 %v27_v8, %v24_v11  ;;  %v48_v20 = vadd.f32 %v47_v13, %v44_v12  ;;  %v68_v21 = vmul.f32 %v67_v17, %v15_v0  ;;  %v71_v22 = vmul.f32 %v70_v18, %v16_v1 }
  0x1b   :  { %v74_v24 = vstv %s118_s29  ;;  %v78_v29 = vstv %s183_s30  ;;  %v91_v53 = vstv %s120_s1  ;;  %v94_v58 = vstv %s121_s3 }
  0x1c   :  { %v31_v25 = vadd.f32 %v30_v15, %v28_v19  ;;  %v52_v26 = vadd.f32 %v51_v16, %v48_v20  ;;  %v72_v27 = vadd.f32 %v71_v22, %v68_v21  ;;  %v75_v28 = vmul.f32 %v74_v24, %v17_v2 }
  0x1d   :  { %v98_v62 = vstv %s122_s4  ;;  %v102_v3 = vstv %s123_s5 }
  0x1e   :  { %v32_v30 = vand.u32 2147483647, %v31_v25  ;;  %v55_v31 = vadd.f32 %v54_v23, %v52_v26  ;;  %v76_v32 = vadd.f32 %v75_v28, %v72_v27  ;;  %vm39_vm0 = vcmp.ge.f32.partialorder %v31_v25, 0.0 }
  0x20   :  { %v33_v33 = vsub.f32 0.0, %v32_v30  ;;  %v56_v34 = vand.u32 2147483647, %v55_v31  ;;  %v79_v35 = vadd.f32 %v78_v29, %v76_v32  ;;  %vm63_vm1 = vcmp.ge.f32.partialorder %v55_v31, 0.0 }
  0x22   :  { %v34_v36 = vmul.f32 1.442695, %v33_v33  ;;  %v57_v37 = vsub.f32 0.0, %v56_v34  ;;  %v80_v38 = vand.u32 2147483647, %v79_v35  ;;  %vm87_vm2 = vcmp.ge.f32.partialorder %v79_v35, 0.0 }
  0x24   :  { %125 = vpow2.f32 %v34_v36  ;;  %v58_v39 = vmul.f32 1.442695, %v57_v37  ;;  %v81_v40 = vsub.f32 0.0, %v80_v38 }
  0x26   :  { %127 = vpow2.f32 %v58_v39  ;;  %v82_v41 = vmul.f32 1.442695, %v81_v40 }
  0x28   :  { %129 = vpow2.f32 %v82_v41 }
  0x2e   :  { %v126_v42 = vpop.eup %125 }
  0x2f   :  { %v36_v43 = vadd.f32 1.0, %v126_v42 }
  0x30   :  { %v128_v44 = vpop.eup %127 }
  0x31   :  { %131 = vrcp.f32 %v36_v43  ;;  %v60_v45 = vadd.f32 1.0, %v128_v44 }
  0x32   :  { %v130_v46 = vpop.eup %129 }
  0x33   :  { %133 = vrcp.f32 %v60_v45  ;;  %v84_v47 = vadd.f32 1.0, %v130_v46 }
  0x35   :  { %135 = vrcp.f32 %v84_v47 }
  0x3b   :  { %v132_v48 = vpop.eup %131 }
  0x3c   :  { %v38_v49 = vmul.f32 %v132_v48, %v126_v42 }
  0x3d   :  { %v134_v50 = vpop.eup %133 }
  0x3e   :  { %v40_v51 = vsub.f32 1.0, %v38_v49  ;;  %v62_v52 = vmul.f32 %v134_v50, %v128_v44 }
  0x3f   :  { %v136_v54 = vpop.eup %135 }
  0x40   :  { %v41_v55 = vsel %vm39_vm0, %v40_v51, %v38_v49  ;;  %v64_v56 = vsub.f32 1.0, %v62_v52  ;;  %v86_v57 = vmul.f32 %v136_v54, %v130_v46 }
  0x41   :  { %v92_v59 = vmul.f32 %v91_v53, %v41_v55 }
  0x42   :  { %v65_v60 = vsel %vm63_vm1, %v64_v56, %v62_v52  ;;  %v88_v61 = vsub.f32 1.0, %v86_v57 }
  0x43   :  { %v95_v63 = vmul.f32 %v94_v58, %v65_v60 }
  0x44   :  { %v89_v0 = vsel %vm87_vm2, %v88_v61, %v86_v57 }
  0x45   :  { %v96_v1 = vadd.f32 %v95_v63, %v92_v59  ;;  %v99_v2 = vmul.f32 %v98_v62, %v89_v0 }
  0x47   :  { %v100_v4 = vadd.f32 %v99_v2, %v96_v1 }
  0x49   :  { %v103_v5 = vadd.f32 %v102_v3, %v100_v4 }
  0x4b   :  { %104 = vst [vmem:[%s193_s2] sm:$0x1] %v103_v5 }

</bundles_post_ra>
